<compile_context>
chip_gen: v6e
topology: v6e:2x2x1
jax: 0.10.0
libtpu: 0.0.40
codegen_flags: <defaults>
</compile_context>

<pallas_src>
import functools

import jax
import jax.numpy as jnp
from jax import lax
from jax.experimental import pallas as pl
from jax.experimental.pallas import tpu as pltpu


def _mlp_kernel(x_ref, w1_ref, b1_ref, w2_ref, b2_ref, w3_ref, b3_ref,
                out_ref, *, sigmoid_out):
    # fc1 + relu  (dropout1 is identity in eval mode)
    h1 = jnp.dot(x_ref[...], w1_ref[...], preferred_element_type=jnp.float32)
    h1 = jnp.maximum(h1 + b1_ref[...], 0.0)                       # (TB, 32)

    # fc2 + relu, computed batch-on-lanes: contract w2 dim 0 with h1 dim 1 so
    # the result is (16, TB) = (h1 @ w2)^T with no explicit transpose of h1.
    h2t = lax.dot_general(w2_ref[...], h1,
                          dimension_numbers=(((0,), (1,)), ((), ())),
                          preferred_element_type=jnp.float32)     # (16, TB)
    h2t = jnp.maximum(h2t + b2_ref[...], 0.0)                     # b2: (16, 1)

    # fc3: out_features == 1 -> VPU multiply + 16-sublane reduce (skip the MXU).
    # w3_ref holds W3 as a (16, 1) column; the reduce lands lane-dense (1, TB).
    h3 = jnp.sum(h2t * w3_ref[...], axis=0, keepdims=True) + b3_ref[...]

    if sigmoid_out:
        h3 = jax.nn.sigmoid(h3)

    # Lane-dense store: batch on lanes -> full 128-lane stores.
    out_ref[...] = h3.astype(out_ref.dtype)


def _round_up(v, m):
    return ((v + m - 1) // m) * m


def _vmem_budget_bytes():
    """Generation-aware VMEM budget for this kernel's residents.

    Scoped-VMEM defaults: v5e 16 MiB (128 MiB physical), v6e 32/128 MiB,
    v7x 32/64 MiB — so the smallest *default* is v5e's 16 MiB and the smallest
    *physical* is v7x's 64 MiB.  We allow up to ~40% of physical VMEM and
    raise vmem_limit_bytes explicitly when the estimate exceeds 12 MiB.
    """
    try:
        phys = pltpu.get_tpu_info().vmem_capacity_bytes
    except Exception:  # be robust if the query is unavailable
        phys = 64 * 1024 * 1024
    return min(phys * 2 // 5, 48 * 1024 * 1024)


def _pick_batch_tile(batch, input_dim, x_itemsize):
    """Largest batch tile (multiple of 128, capped at 8192) whose residents
    (double-buffered x tile, h1, h2^T, double-buffered output, weights) fit
    the generation-aware VMEM budget."""
    budget = _vmem_budget_bytes()
    weight_bytes = 4 * (input_dim * 32 + 32 + 32 * 16 + 16 + 16 + 1)
    # Per-batch-row bytes:
    #   x tile   : 2 buffers x input_dim x itemsize
    #   h1       : 32 f32     (TB, 32)
    #   h2^T     : 16 f32     (16, TB)
    #   out slab : 2 buffers x 1 f32
    per_row = 2 * input_dim * x_itemsize + 32 * 4 + 16 * 4 + 2 * 4
    rows = max(128, (budget - weight_bytes) // per_row)
    cap = max(128, min(8192, (rows // 128) * 128))
    tb = min(cap, _round_up(batch, 128))
    used = weight_bytes + per_row * tb
    return tb, used


def net_forward(x, params, *, sigmoid_out=True):
    """Pallas implementation of Net.forward (eval mode).

    x: (B, input_dim) float32 or bfloat16
    params: dict with w1(b1), w2(b2), w3(b3); weights in (in, out) layout.
    Returns: (B,) float32  (matches torch x.squeeze() for B > 1).
    """
    B, input_dim = x.shape
    w1, b1 = params["w1"], params["b1"]
    w2 = params["w2"]
    # fc2 bias as a (16, 1) column (batch-on-lanes layout for the last stage).
    b2_col = params["b2"].reshape(-1, 1)
    # fc3 has a single output unit: keep W3 as a (16, 1) column so the kernel
    # can do a VPU multiply + sublane reduce, plus a (1, 1) bias.
    w3_col = params["w3"].reshape(-1, 1)
    b3 = params["b3"].reshape(1, 1)

    tb, used_bytes = _pick_batch_tile(B, input_dim, x.dtype.itemsize)
    bp = _round_up(B, tb)
    if bp != B:
        x = jnp.pad(x, ((0, bp - B), (0, 0)))

    kernel = functools.partial(_mlp_kernel, sigmoid_out=sigmoid_out)

    # Weights/biases: full-array blocks with a constant index_map so they are
    # DMA'd once and stay VMEM-resident across the batch grid.
    const = lambda a: pl.BlockSpec(a.shape, lambda i: (0,) * a.ndim)

    # Only raise the scoped-VMEM limit when we actually need more than the
    # smallest default (v5e's 16 MiB); cap below v7x's 64 MiB physical.
    vmem_limit = None
    if used_bytes > 12 * 1024 * 1024:
        vmem_limit = int(min(48 * 1024 * 1024, used_bytes * 3 // 2))

    out = pl.pallas_call(
        kernel,
        out_shape=jax.ShapeDtypeStruct((1, bp), jnp.float32),
        grid_spec=pltpu.PrefetchScalarGridSpec(
            num_scalar_prefetch=0,
            grid=(bp // tb,),
            in_specs=[
                pl.BlockSpec((tb, input_dim), lambda i: (i, 0)),  # x: batch-tiled
                const(w1), const(b1),
                const(w2), const(b2_col),
                const(w3_col), const(b3),
            ],
            out_specs=pl.BlockSpec((1, tb), lambda i: (0, i)),    # lane-dense
        ),
        compiler_params=pltpu.CompilerParams(
            dimension_semantics=("parallel",),
            vmem_limit_bytes=vmem_limit),
    )(x, w1, b1, w2, b2_col, w3_col, b3)

    # torch: x.squeeze() -> drop the singleton feature dim (and batch padding).
    # Note: for B == 1 torch returns a 0-d tensor; here we return shape (1,).
    return out[0, :B]


def init_params(key, input_dim):
    """Deterministic init matching nn.Linear shapes (stored transposed: (in, out))."""
    k1, k2, k3, k4, k5, k6 = jax.random.split(key, 6)

    def uniform_linear(kw, kb, fan_in, fan_out):
        bound = 1.0 / jnp.sqrt(fan_in)
        w = jax.random.uniform(kw, (fan_in, fan_out), jnp.float32, -bound, bound)
        b = jax.random.uniform(kb, (1, fan_out), jnp.float32, -bound, bound)
        return w, b

    w1, b1 = uniform_linear(k1, k2, input_dim, 32)
    w2, b2 = uniform_linear(k3, k4, 32, 16)
    w3, b3 = uniform_linear(k5, k6, 16, 1)
    return {"w1": w1, "b1": b1, "w2": w2, "b2": b2, "w3": w3, "b3": b3}


def _ref_forward(x, params, *, sigmoid_out=True):
    """Pure-JAX reference of Net.forward (eval mode) for correctness check."""
    h = jnp.maximum(x @ params["w1"] + params["b1"], 0.0)
    h = jnp.maximum(h @ params["w2"] + params["b2"], 0.0)
    h = h @ params["w3"] + params["b3"]
    if sigmoid_out:
        h = jax.nn.sigmoid(h)
    return h[:, 0]


if __name__ == "__main__":
    key = jax.random.PRNGKey(0)
    kx, kp = jax.random.split(key)

    batch = 8
    input_dim = 32
    x = jax.random.normal(kx, (batch, input_dim), dtype=jnp.float32)
    params = init_params(kp, input_dim)

    y = net_forward(x, params, sigmoid_out=True)
    jax.block_until_ready(y)

    assert y.shape == (batch,)
    y_ref = _ref_forward(x, params, sigmoid_out=True)
    assert jnp.allclose(y, y_ref, atol=1e-5, rtol=1e-5), "mismatch vs reference"
    print("KERNEL_OK")
</pallas_src>

<mosaic_0001>
module attributes {stable_mosaic.version = 11 : i64} {
  func.func @_mlp_kernel(%arg0: i32, %arg1: memref<128x32xf32, #tpu.memory_space<vmem>>, %arg2: memref<32x32xf32, #tpu.memory_space<vmem>>, %arg3: memref<1x32xf32, #tpu.memory_space<vmem>>, %arg4: memref<32x16xf32, #tpu.memory_space<vmem>>, %arg5: memref<16x1xf32, #tpu.memory_space<vmem>>, %arg6: memref<16x1xf32, #tpu.memory_space<vmem>>, %arg7: memref<1x1xf32, #tpu.memory_space<vmem>>, %arg8: memref<1x128xf32, #tpu.memory_space<vmem>>) attributes {dimension_semantics = [#tpu.dimension_semantics<parallel>], iteration_bounds = array<i64: 1>, scalar_prefetch = 0 : i64, scratch_operands = 0 : i64, tpu.core_type = #tpu.core_type<tc>, window_params = [{transform_indices = @transform_0, window_bounds = array<i64: 128, 32>}, {pipeline_mode = #tpu.pipeline_mode<synchronous>, transform_indices = @transform_1, window_bounds = array<i64: 32, 32>}, {pipeline_mode = #tpu.pipeline_mode<synchronous>, transform_indices = @transform_2, window_bounds = array<i64: 1, 32>}, {pipeline_mode = #tpu.pipeline_mode<synchronous>, transform_indices = @transform_3, window_bounds = array<i64: 32, 16>}, {pipeline_mode = #tpu.pipeline_mode<synchronous>, transform_indices = @transform_4, window_bounds = array<i64: 16, 1>}, {pipeline_mode = #tpu.pipeline_mode<synchronous>, transform_indices = @transform_5, window_bounds = array<i64: 16, 1>}, {pipeline_mode = #tpu.pipeline_mode<synchronous>, transform_indices = @transform_6, window_bounds = array<i64: 1, 1>}, {transform_indices = @transform_7, window_bounds = array<i64: 1, 128>}]} {
    %c0 = arith.constant 0 : index
    %c0_0 = arith.constant 0 : index
    %0 = vector.load %arg1[%c0, %c0_0] : memref<128x32xf32, #tpu.memory_space<vmem>>, vector<128x32xf32>
    %c0_1 = arith.constant 0 : index
    %c0_2 = arith.constant 0 : index
    %1 = vector.load %arg2[%c0_1, %c0_2] : memref<32x32xf32, #tpu.memory_space<vmem>>, vector<32x32xf32>
    %cst = arith.constant dense<0.000000e+00> : vector<128x32xf32>
    %2 = tpu.matmul %0, %1, %cst {dimension_numbers = #tpu.dot_dimension_numbers<[1], [0], [0], [1], [0, 0, 1, 1], [], []>} : vector<128x32xf32>, vector<32x32xf32>, vector<128x32xf32> -> vector<128x32xf32>
    %c0_3 = arith.constant 0 : index
    %c0_4 = arith.constant 0 : index
    %3 = vector.load %arg3[%c0_3, %c0_4] : memref<1x32xf32, #tpu.memory_space<vmem>>, vector<1x32xf32>
    %4 = vector.broadcast %3 : vector<1x32xf32> to vector<128x32xf32>
    %5 = arith.addf %2, %4 : vector<128x32xf32>
    %cst_5 = arith.constant 0.000000e+00 : f32
    %6 = vector.broadcast %cst_5 : f32 to vector<128x32xf32>
    %7 = arith.maximumf %5, %6 : vector<128x32xf32>
    %c0_6 = arith.constant 0 : index
    %c0_7 = arith.constant 0 : index
    %8 = vector.load %arg4[%c0_6, %c0_7] : memref<32x16xf32, #tpu.memory_space<vmem>>, vector<32x16xf32>
    %cst_8 = arith.constant dense<0.000000e+00> : vector<16x128xf32>
    %9 = tpu.matmul %8, %7, %cst_8 {dimension_numbers = #tpu.dot_dimension_numbers<[0], [1], [1], [0], [0, 1, 1, 0], [], []>} : vector<32x16xf32>, vector<128x32xf32>, vector<16x128xf32> -> vector<16x128xf32>
    %c0_9 = arith.constant 0 : index
    %c0_10 = arith.constant 0 : index
    %10 = vector.load %arg5[%c0_9, %c0_10] : memref<16x1xf32, #tpu.memory_space<vmem>>, vector<16x1xf32>
    %11 = vector.broadcast %10 : vector<16x1xf32> to vector<16x128xf32>
    %12 = arith.addf %9, %11 : vector<16x128xf32>
    %cst_11 = arith.constant 0.000000e+00 : f32
    %13 = vector.broadcast %cst_11 : f32 to vector<16x128xf32>
    %14 = arith.maximumf %12, %13 : vector<16x128xf32>
    %c0_12 = arith.constant 0 : index
    %c0_13 = arith.constant 0 : index
    %15 = vector.load %arg6[%c0_12, %c0_13] : memref<16x1xf32, #tpu.memory_space<vmem>>, vector<16x1xf32>
    %16 = vector.broadcast %15 : vector<16x1xf32> to vector<16x128xf32>
    %17 = arith.mulf %14, %16 : vector<16x128xf32>
    %cst_14 = arith.constant dense<0.000000e+00> : vector<128xf32>
    %18 = vector.multi_reduction <add>, %17, %cst_14 [0] : vector<16x128xf32> to vector<128xf32>
    %19 = vector.shape_cast %18 : vector<128xf32> to vector<1x128xf32>
    %c0_15 = arith.constant 0 : index
    %c0_16 = arith.constant 0 : index
    %20 = vector.load %arg7[%c0_15, %c0_16] : memref<1x1xf32, #tpu.memory_space<vmem>>, vector<1x1xf32>
    %21 = vector.broadcast %20 : vector<1x1xf32> to vector<1x128xf32>
    %22 = arith.addf %19, %21 : vector<1x128xf32>
    %23 = arith.negf %22 : vector<1x128xf32>
    %24 = math.exp %23 : vector<1x128xf32>
    %cst_17 = arith.constant 1.000000e+00 : f32
    %25 = vector.broadcast %cst_17 : f32 to vector<1x128xf32>
    %26 = arith.addf %25, %24 : vector<1x128xf32>
    %27 = arith.divf %25, %26 : vector<1x128xf32>
    %c0_18 = arith.constant 0 : index
    %c0_19 = arith.constant 0 : index
    %28 = vector.load %arg8[%c0_18, %c0_19] : memref<1x128xf32, #tpu.memory_space<vmem>>, vector<1x128xf32>
    tpu.vector_store %arg8[%c0_18, %c0_19], %27 {strides = array<i32>} : memref<1x128xf32, #tpu.memory_space<vmem>>, vector<1x128xf32>,
    return
  }
  func.func @transform_0(%arg0: i32) -> (i32, i32) {
    %c0_i32 = arith.constant 0 : i32
    %c0_i32_0 = arith.constant 0 : i32
    return %arg0, %c0_i32 : i32, i32
  }
  func.func @transform_1(%arg0: i32) -> (i32, i32) {
    %c0_i32 = arith.constant 0 : i32
    %c0_i32_0 = arith.constant 0 : i32
    %c0_i32_1 = arith.constant 0 : i32
    return %c0_i32, %c0_i32_0 : i32, i32
  }
  func.func @transform_2(%arg0: i32) -> (i32, i32) {
    %c0_i32 = arith.constant 0 : i32
    %c0_i32_0 = arith.constant 0 : i32
    %c0_i32_1 = arith.constant 0 : i32
    return %c0_i32, %c0_i32_0 : i32, i32
  }
  func.func @transform_3(%arg0: i32) -> (i32, i32) {
    %c0_i32 = arith.constant 0 : i32
    %c0_i32_0 = arith.constant 0 : i32
    %c0_i32_1 = arith.constant 0 : i32
    return %c0_i32, %c0_i32_0 : i32, i32
  }
  func.func @transform_4(%arg0: i32) -> (i32, i32) {
    %c0_i32 = arith.constant 0 : i32
    %c0_i32_0 = arith.constant 0 : i32
    %c0_i32_1 = arith.constant 0 : i32
    return %c0_i32, %c0_i32_0 : i32, i32
  }
  func.func @transform_5(%arg0: i32) -> (i32, i32) {
    %c0_i32 = arith.constant 0 : i32
    %c0_i32_0 = arith.constant 0 : i32
    %c0_i32_1 = arith.constant 0 : i32
    return %c0_i32, %c0_i32_0 : i32, i32
  }
  func.func @transform_6(%arg0: i32) -> (i32, i32) {
    %c0_i32 = arith.constant 0 : i32
    %c0_i32_0 = arith.constant 0 : i32
    %c0_i32_1 = arith.constant 0 : i32
    return %c0_i32, %c0_i32_0 : i32, i32
  }
  func.func @transform_7(%arg0: i32) -> (i32, i32) {
    %c0_i32 = arith.constant 0 : i32
    %c0_i32_0 = arith.constant 0 : i32
    return %c0_i32, %arg0 : i32, i32
  }
}

</mosaic_0001>

<bundles_post_ra>
// kernel: tpu_custom_call.1
= control target key start
LH: loop header
LB: loop body
LE: loop exit
PB: predicated region body
PF: predicated region fallthrough
CT: control target
= control target key end

     0   :  { %s864_s0 = inlined_call_operand.vmem [shape: f32[128,32], index: 0, kind: input, shape index: {}]   ;;  %s865_s1 = inlined_call_operand.vmem [shape: f32[32,32], index: 1, kind: input, shape index: {}]   ;;  %s866_s2 = inlined_call_operand.vmem [shape: f32[1,32], index: 2, kind: input, shape index: {}]   ;;  %s867_s3 = inlined_call_operand.vmem [shape: f32[32,16], index: 3, kind: input, shape index: {}]   ;;  %s868_s4 = inlined_call_operand.vmem [shape: f32[16,1], index: 4, kind: input, shape index: {}]   ;;  %s869_s5 = inlined_call_operand.vmem [shape: f32[16,1], index: 5, kind: input, shape index: {}]   ;;  %s870_s6 = inlined_call_operand.<no memory space> [shape: f32[1,1], index: 6, kind: input, shape index: {}]   ;;  %s871_s7 = inlined_call_operand.hbm [shape: f32[1,128], index: 7, kind: output, shape index: {}]  }
   0x1   :  { %v12_v0 = vstv %s870_s6 }
   0x2   :  { %13 = vst [vmem:[#allocation2] sm:$0x1] %v12_v0 }
   0x3   :  { %v48_v1 = vld [vmem:[%s865_s1 + $0x18] sm:$0xff]  ;;  %v47_v2 = vld [vmem:[%s865_s1 + $0x10] sm:$0xff]  ;;  %vm56_vm0 = vcmask 261120   ;;  %v29_v3 = vld [vmem:[%s864_s0] sm:$0xff] }
   0x4   :  { %572 = vmatprep.subr.mxu0 %v48_v1  ;;  %v46_v4 = vld [vmem:[%s865_s1 + $0x8] sm:$0xff]  ;;  %580 = vmatprep.mubr.msk.f32.mxu0 %vm56_vm0, %v29_v3  ;;  %v45_v5 = vld [vmem:[%s865_s1] sm:$0xff]  ;;  %v31_v8 = vld [vmem:[%s864_s0 + $0x10] sm:$0xff] }
   0x5   :  { %573 = vmatpush3.msra.mxu0 %v48_v1  ;;  %v30_v6 = vld [vmem:[%s864_s0 + $0x8] sm:$0xff]  ;;  %v266_v7 = vld [vmem:[%s867_s3] sm:$0xff] }
   0x6   :  { %574 = vmatprep.subr.mxu0 %v47_v2  ;;  %282 = vxpose.xlu0.b32.start [1/4] (short) (narrow) %v266_v7, 16  ;;  %v267_v9 = vld [vmem:[%s867_s3 + $0x8] sm:$0xff] }
   0x7   :  { %575 = vmatpush3.msra.mxu0 %v47_v2 }
   0x8   :  { %576 = vmatprep.subr.mxu0 %v46_v4 }
   0x9   :  { %577 = vmatpush3.msra.mxu0 %v46_v4 }
   0xa   :  { %578 = vmatprep.subr.mxu0 %v45_v5 }
   0xb   :  { %579 = vmatpush3.msra.mxu0 %v45_v5 }
   0xc   :  { %14 = vsyncpa [#allocation4], 0  ;;  %581 = vmatmul.mubr.msk.f32.vlgmr.msra.gmra.mxu0 %vm56_vm0, %v30_v6  ;;  %v32_v10 = vld [vmem:[%s864_s0 + $0x18] sm:$0xff]  ;;  %v33_v11 = vld [vmem:[%s864_s0 + $0x20] sm:$0xff]  ;;  %283 = vxpose.xlu0.b32.cont [2/4] (short) (narrow) %v267_v9, 16  ;;  %v670_v27 = vmov 0  }
   0xd   :  { %583 = vmatprep.mubr.msk.f32.mxu0 %vm56_vm0, %v31_v8  ;;  %v268_v12 = vld [vmem:[%s867_s3 + $0x10] sm:$0xff]  ;;  %v34_v13 = vld [vmem:[%s864_s0 + $0x28] sm:$0xff]  ;;  %v269_v15 = vld [vmem:[%s867_s3 + $0x18] sm:$0xff]  ;;  %642 = vset.pattern.permute.xlu1 %v670_v27 }
   0xe   :  { %v35_v14 = vld [vmem:[%s864_s0 + $0x30] sm:$0xff]  ;;  %v36_v16 = vld [vmem:[%s864_s0 + $0x38] sm:$0xff]  ;;  %v37_v17 = vld [vmem:[%s864_s0 + $0x40] sm:$0xff] }
   0xf   :  { %v38_v18 = vld [vmem:[%s864_s0 + $0x48] sm:$0xff]  ;;  %v39_v19 = vld [vmem:[%s864_s0 + $0x50] sm:$0xff]  ;;  %v40_v20 = vld [vmem:[%s864_s0 + $0x58] sm:$0xff] }
  0x10   :  { %584 = vmatmul.mubr.msk.f32.gmra.mxu0 %vm56_vm0, %v32_v10  ;;  %284 = vxpose.xlu0.b32.cont [3/4] (short) (narrow) %v268_v12, 16  ;;  %v41_v21 = vld [vmem:[%s864_s0 + $0x60] sm:$0xff]  ;;  %v42_v22 = vld [vmem:[%s864_s0 + $0x68] sm:$0xff]  ;;  %v43_v23 = vld [vmem:[%s864_s0 + $0x70] sm:$0xff] }
  0x11   :  { %586 = vmatprep.mubr.msk.f32.mxu0 %vm56_vm0, %v33_v11  ;;  %v44_v24 = vld [vmem:[%s864_s0 + $0x78] sm:$0xff]  ;;  %v270_v26 = vld [vmem:[%s868_s4] sm:$0xff]  ;;  %v271_v29 = vld [vmem:[%s868_s4 + $0x8] sm:$0xff] }
  0x12   :  { %v466_v28 = vld [vmem:[#allocation2] sm:$0x1]  ;;  %274 = vperm.xlu1 %642, %v270_v26   ;;  %v446_v31 = vld [vmem:[%s869_s5 + $0x8] sm:$0xff] }
  0x13   :  { %v445_v30 = vld [vmem:[%s869_s5] sm:$0xff] }
  0x14   :  { %587 = vmatmul.mubr.msk.f32.gmra.mxu0 %vm56_vm0, %v34_v13  ;;  %285 = vxpose.xlu0.b32.end [4/4] (short) (narrow) %v269_v15, 16  ;;  %v498_v46 = vld [vmem:[%s866_s2] ss:$0 sm:$0xff]  ;;  %s671_s2 = smov [#allocation3]  }
  0x15   :  { %589 = vmatprep.mubr.msk.f32.mxu0 %vm56_vm0, %v35_v14  ;;  %s490_s30 = sshll.u32 %s671_s2, 4  ;;  %s491_s30 = int_to_ptr.vmem [resolvable:$true] %s490_s30 }
  0x16   :  { %279 = vperm.xlu1 %642, %v271_v29   ;;  %s648_s8 = scalar_lea.vmem %s491_s30, 16  ;;  %s652_s9 = scalar_lea.vmem %s491_s30, 32 }
  0x17   :  { %p649_p0 = scmp.ne.s32.totalorder %s491_s30, %s648_s8  ;;  %p653_p1 = scmp.lt.s32.totalorder %s491_s30, %s491_s30 }
  0x18   :  { %590 = vmatmul.mubr.msk.f32.gmra.mxu0 %vm56_vm0, %v36_v16  ;;  %p654_p2 = scmp.lt.s32.totalorder %s652_s9, %s648_s8 }
  0x19   :  { %592 = vmatprep.mubr.msk.f32.mxu0 %vm56_vm0, %v37_v17 }
  0x1a   :  { %449 = vperm.xlu1 %642, %v445_v30   ;;  %v472_v30 = vlaneseq  ;;  %p655_p3 = por %p654_p2, %p653_p1 }
  0x1c   :  { %593 = vmatmul.mubr.msk.f32.gmra.mxu0 %vm56_vm0, %v38_v18  ;;  %p656_p4 = pnand %p655_p3, %p649_p0 }
  0x1d   :  { %595 = vmatprep.mubr.msk.f32.mxu0 %vm56_vm0, %v39_v19 }
  0x1e   :  { %454 = vperm.xlu1 %642, %v446_v31  }
  0x20   :  { %596 = vmatmul.mubr.msk.f32.gmra.mxu0 %vm56_vm0, %v40_v20 }
  0x21   :  { %598 = vmatprep.mubr.msk.f32.mxu0 %vm56_vm0, %v41_v21 }
  0x24   :  { %599 = vmatmul.mubr.msk.f32.gmra.mxu0 %vm56_vm0, %v42_v22 }
  0x25   :  { %601 = vmatprep.mubr.msk.f32.mxu0 %vm56_vm0, %v43_v23 }
  0x28   :  { %602 = vmatmul.mubr.msk.f32.gmra.mxu0 %vm56_vm0, %v44_v24 }
  0x3d   :  { %643 = vset.pattern.permute.xlu0 %v670_v27 }
  0x3e   :  { %469 = vperm.xlu0 %643, %v466_v28  }
  0x84   :  { %v298_v25 = vpop.trf.xlu0 }
  0x85   :  { %636 = vmatprep.mubr.msk.f32.mxu1 %vm56_vm0, %v298_v25 }
  0x88   :  { %v299_v17 = vpop.trf.xlu0 }
  0x8d   :  { %v275_v18 = vpop.permute.xlu1 %274 }
  0x91   :  { %v280_v19 = vpop.permute.xlu1 %279 }
  0x95   :  { %v450_v20 = vpop.permute.xlu1 %449 }
  0x99   :  { %v455_v27 = vpop.permute.xlu1 %454 }
  0xcc   :  { %v816_v32 = vpop.f32.mrf.mxu0 }
  0xcd   :  { %v177_v12 = vadd.f32 %v816_v32, %v498_v46 }
  0xce   :  { %v818_v33 = vpop.f32.mrf.mxu0 }
  0xcf   :  { %v251_v14 = vmax.f32 %v177_v12, 0.0  ;;  %v172_v15 = vadd.f32 %v498_v46, %v818_v33  ;;  %v473_v33 = vshrl.u32 %v472_v30, 7 }
  0xd0   :  { %v585_v34 = vpop.f32.mrf.mxu0 }
  0xd1   :  { %v187_v8 = vadd.f32 %v585_v34, %v498_v46  ;;  %v250_v16 = vmax.f32 %v172_v15, 0.0 }
  0xd2   :  { %v820_v35 = vpop.f32.mrf.mxu0 }
  0xd3   :  { %v253_v10 = vmax.f32 %v187_v8, 0.0  ;;  %v182_v11 = vadd.f32 %v498_v46, %v820_v35  ;;  %v474_v35 = vsub.s32 0, %v473_v33 }
  0xd4   :  { %v588_v36 = vpop.f32.mrf.mxu0 }
  0xd5   :  { %v197_v4 = vadd.f32 %v588_v36, %v498_v46  ;;  %v252_v13 = vmax.f32 %v182_v11, 0.0 }
  0xd6   :  { %v191_v37 = vpop.f32.mrf.mxu0 }
  0xd7   :  { %v255_v6 = vmax.f32 %v197_v4, 0.0  ;;  %v192_v7 = vadd.f32 %v498_v46, %v191_v37  ;;  %v470_v37 = vpop.permute.xlu0 %469 }
  0xd8   :  { %v591_v38 = vpop.f32.mrf.mxu0 }
  0xd9   :  { %v207_v0 = vadd.f32 %v591_v38, %v498_v46  ;;  %v254_v9 = vmax.f32 %v192_v7, 0.0 }
  0xda   :  { %v201_v39 = vpop.f32.mrf.mxu0 }
  0xdb   :  { %v257_v2 = vmax.f32 %v207_v0, 0.0  ;;  %v202_v3 = vadd.f32 %v498_v46, %v201_v39 }
  0xdc   :  { %v594_v40 = vpop.f32.mrf.mxu0 }
  0xdd   :  { %v217_v60 = vadd.f32 %v594_v40, %v498_v46  ;;  %v256_v5 = vmax.f32 %v202_v3, 0.0  ;;  %v475_v40 = vrot.slane %v470_v37, %v474_v35 }
  0xde   :  { %v211_v41 = vpop.f32.mrf.mxu0 }
  0xdf   :  { %v259_v62 = vmax.f32 %v217_v60, 0.0  ;;  %v212_v63 = vadd.f32 %v498_v46, %v211_v41 }
  0xe0   :  { %v597_v42 = vpop.f32.mrf.mxu0 }
  0xe1   :  { %v227_v56 = vadd.f32 %v597_v42, %v498_v46  ;;  %v258_v1 = vmax.f32 %v212_v63, 0.0 }
  0xe2   :  { %v221_v43 = vpop.f32.mrf.mxu0 }
  0xe3   :  { %v261_v58 = vmax.f32 %v227_v56, 0.0  ;;  %v222_v59 = vadd.f32 %v498_v46, %v221_v43 }
  0xe4   :  { %v600_v44 = vpop.f32.mrf.mxu0 }
  0xe5   :  { %v237_v52 = vadd.f32 %v600_v44, %v498_v46  ;;  %v260_v61 = vmax.f32 %v222_v59, 0.0 }
  0xe6   :  { %v231_v45 = vpop.f32.mrf.mxu0 }
  0xe7   :  { %v263_v54 = vmax.f32 %v237_v52, 0.0  ;;  %v232_v55 = vadd.f32 %v498_v46, %v231_v45 }
  0xe8   :  { %v603_v47 = vpop.f32.mrf.mxu0 }
  0xe9   :  { %v247_v48 = vadd.f32 %v603_v47, %v498_v46  ;;  %v262_v57 = vmax.f32 %v232_v55, 0.0 }
  0xea   :  { %v241_v49 = vpop.f32.mrf.mxu0 }
  0xeb   :  { %v265_v50 = vmax.f32 %v247_v48, 0.0  ;;  %v242_v51 = vadd.f32 %v498_v46, %v241_v49 }
  0xed   :  { %v264_v53 = vmax.f32 %v242_v51, 0.0  ;;  %604 = vmatprep.subr.msk.mxu1 %vm56_vm0, %v265_v50 }
  0xee   :  { %605 = vmatpush3.xpose.msk.msra.mxu1 %vm56_vm0, %v265_v50 }
  0xef   :  { %606 = vmatprep.subr.msk.mxu1 %vm56_vm0, %v264_v53 }
  0xf2   :  { %607 = vmatpush3.xpose.msk.msra.mxu1 %vm56_vm0, %v264_v53 }
  0xf3   :  { %608 = vmatprep.subr.msk.mxu1 %vm56_vm0, %v263_v54 }
  0xf6   :  { %609 = vmatpush3.xpose.msk.msra.mxu1 %vm56_vm0, %v263_v54 }
  0xf7   :  { %610 = vmatprep.subr.msk.mxu1 %vm56_vm0, %v262_v57 }
  0xfa   :  { %611 = vmatpush3.xpose.msk.msra.mxu1 %vm56_vm0, %v262_v57 }
  0xfb   :  { %612 = vmatprep.subr.msk.mxu1 %vm56_vm0, %v261_v58 }
  0xfe   :  { %613 = vmatpush3.xpose.msk.msra.mxu1 %vm56_vm0, %v261_v58 }
  0xff   :  { %614 = vmatprep.subr.msk.mxu1 %vm56_vm0, %v260_v61 }
 0x102   :  { %615 = vmatpush3.xpose.msk.msra.mxu1 %vm56_vm0, %v260_v61 }
 0x103   :  { %616 = vmatprep.subr.msk.mxu1 %vm56_vm0, %v259_v62 }
 0x106   :  { %617 = vmatpush3.xpose.msk.msra.mxu1 %vm56_vm0, %v259_v62 }
 0x107   :  { %618 = vmatprep.subr.msk.mxu1 %vm56_vm0, %v258_v1 }
 0x10a   :  { %619 = vmatpush3.xpose.msk.msra.mxu1 %vm56_vm0, %v258_v1 }
 0x10b   :  { %620 = vmatprep.subr.msk.mxu1 %vm56_vm0, %v257_v2 }
 0x10e   :  { %621 = vmatpush3.xpose.msk.msra.mxu1 %vm56_vm0, %v257_v2 }
 0x10f   :  { %622 = vmatprep.subr.msk.mxu1 %vm56_vm0, %v256_v5 }
 0x112   :  { %623 = vmatpush3.xpose.msk.msra.mxu1 %vm56_vm0, %v256_v5 }
 0x113   :  { %624 = vmatprep.subr.msk.mxu1 %vm56_vm0, %v255_v6 }
 0x116   :  { %625 = vmatpush3.xpose.msk.msra.mxu1 %vm56_vm0, %v255_v6 }
 0x117   :  { %626 = vmatprep.subr.msk.mxu1 %vm56_vm0, %v254_v9 }
 0x11a   :  { %627 = vmatpush3.xpose.msk.msra.mxu1 %vm56_vm0, %v254_v9 }
 0x11b   :  { %628 = vmatprep.subr.msk.mxu1 %vm56_vm0, %v253_v10 }
 0x11e   :  { %629 = vmatpush3.xpose.msk.msra.mxu1 %vm56_vm0, %v253_v10 }
 0x11f   :  { %630 = vmatprep.subr.msk.mxu1 %vm56_vm0, %v252_v13 }
 0x122   :  { %631 = vmatpush3.xpose.msk.msra.mxu1 %vm56_vm0, %v252_v13 }
 0x123   :  { %632 = vmatprep.subr.msk.mxu1 %vm56_vm0, %v251_v14 }
 0x126   :  { %633 = vmatpush3.xpose.msk.msra.mxu1 %vm56_vm0, %v251_v14 }
 0x127   :  { %634 = vmatprep.subr.msk.mxu1 %vm56_vm0, %v250_v16 }
 0x12a   :  { %635 = vmatpush3.xpose.msk.msra.mxu1 %vm56_vm0, %v250_v16 }
 0x12d   :  { %637 = vmatmul.mubr.msk.f32.vlgmr.msra.gmra.mxu1 %vm56_vm0, %v299_v17 }
 0x1ed   :  { %v638_v21 = vpop.f32.mrf.mxu1 }
 0x1ee   :  { %v440_v22 = vadd.f32 %v638_v21, %v280_v19 }
 0x1ef   :  { %v434_v23 = vpop.f32.mrf.mxu1 }
 0x1f0   :  { %v444_v24 = vmax.f32 %v440_v22, 0.0  ;;  %v435_v25 = vadd.f32 %v434_v23, %v275_v18 }
 0x1f2   :  { %v443_v26 = vmax.f32 %v435_v25, 0.0  ;;  %v458_v28 = vmul.f32 %v455_v27, %v444_v24 }
 0x1f4   :  { %v457_v29 = vmul.f32 %v450_v20, %v443_v26 }
 0x1f6   :  { %v459_v31 = vadd.f32 %v458_v28, %v457_v29 }
 0x1f8   :  { %v460_v32 = vrot.slane %v459_v31, 4 }
 0x1fa   :  { %v461_v34 = vadd.f32 %v460_v32, %v459_v31 }
 0x1fc   :  { %v462_v36 = vrot.slane %v461_v34, 2 }
 0x1fe   :  { %v463_v38 = vadd.f32 %v462_v36, %v461_v34 }
 0x200   :  { %v464_v39 = vrot.slane %v463_v38, 1 }
 0x202   :  { %v465_v41 = vadd.f32 %v464_v39, %v463_v38 }
 0x204   :  { %v476_v42 = vadd.f32 %v475_v40, %v465_v41 }
 0x206   :  { %v533_v43 = vmul.f32 -1.442695, %v476_v42 }
 0x208   :  { %644 = vpow2.f32 %v533_v43 }
 0x215   :  { %v645_v44 = vpop.eup %644 }
 0x216   :  { %v480_v45 = vadd.f32 1.0, %v645_v44 }
 0x218   :  { %646 = vrcp.f32 %v480_v45 }
 0x225   :  { %v647_v46 = vpop.eup %646 }
 0x226   :  { %483 = vst [vmem:[#allocation3] sm:$0x1] %v647_v46 }
 0x227   :  { %659 = shalt.err (!%p656_p4)
}
 0x228   :  { %493 = dma.vmem_to_hbm [thread:$0]  %s491_s30, 16, %s871_s7, [#allocation4]  }
 0x229   :  { %668 = dma.done.wait [#allocation4], 16  }
 0x22a   :  { %669 = vsyncadd [#allocation4], 4294967280 }
 0x22b   :  { %497 = vsyncpa [#allocation4], 1 }

</bundles_post_ra>
